<compile_context>
chip_gen: v7x
topology: tpu7x:2x2x1
jax: 0.10.0
libtpu: 0.0.40
codegen_flags: <defaults>
</compile_context>

<pallas_src>
import functools
import math

import jax
import jax.numpy as jnp
from jax.experimental import pallas as pl


def _full_spec(shape):
    # single-block spec covering the whole array (grid=(1,))
    return pl.BlockSpec(shape, lambda i: tuple(0 for _ in shape))


def _transformer_conv(x_mm, neg_mask, has_edge, w, b, *, heads, head_dim, mm_dtype):
    """One TransformerConv layer with fused ReLU. Returns f32 (N, heads*head_dim)."""
    hd = heads * head_dim
    # Fused q/k/v/skip projection: ONE (N, Fin) @ (Fin, 4*H*D) MXU matmul (f32 accum).
    qkvs = jnp.dot(x_mm, w, preferred_element_type=jnp.float32) + b      # (N, 4*H*D) f32
    scale = 1.0 / math.sqrt(head_dim)
    qh = jnp.stack([qkvs[:, h * head_dim:(h + 1) * head_dim]
                    for h in range(heads)], axis=0) * scale               # (H, N, D) f32
    kh = jnp.stack([qkvs[:, hd + h * head_dim: hd + (h + 1) * head_dim]
                    for h in range(heads)], axis=0)                       # (H, N, D) f32
    vh = jnp.stack([qkvs[:, 2 * hd + h * head_dim: 2 * hd + (h + 1) * head_dim]
                    for h in range(heads)], axis=0)                       # (H, N, D) f32
    skip = qkvs[:, 3 * hd:4 * hd]                                         # (N, H*D)  f32

    # scores[h, i, j] = <q_i, k_j> / sqrt(d); batched over heads, no k.T transpose.
    s = jnp.einsum('hnd,hmd->hnm', qh.astype(mm_dtype), kh.astype(mm_dtype),
                   preferred_element_type=jnp.float32)                    # (H, N, N) f32
    s = s + neg_mask[None, :, :]          # additive mask: 0 on edges, -1e30 elsewhere
    m = jnp.max(s, axis=-1, keepdims=True)
    p = jnp.exp(s - m)                    # masked entries underflow to exactly 0 on rows w/ edges
    denom = jnp.sum(p, axis=-1, keepdims=True)          # >= 1 (max entry contributes exp(0)=1)
    alpha = p * pl.reciprocal(denom, approx=True)
    # TODO(synk): attention dropout (p=self.dropout in PyG) skipped -- eval-mode identity.

    attn = jnp.einsum('hnm,hmd->hnd', alpha.astype(mm_dtype), vh.astype(mm_dtype),
                      preferred_element_type=jnp.float32)                 # (H, N, D) f32
    attn2d = jnp.concatenate([attn[h] for h in range(heads)], axis=-1)    # (N, H*D)
    # has_edge gates zero-in-degree nodes (attention term = 0, only the skip remains).
    return jnp.maximum(attn2d * has_edge + skip, 0.0)                     # ReLU fused


def _graph_transformer_kernel(x_ref, neg_mask_ref, has_edge_ref,
                              w1_ref, b1_ref, w2_ref, b2_ref, wfc_ref, bfc_ref,
                              o_ref, *, heads, head_dim, mm_dtype):
    neg_mask = neg_mask_ref[...].astype(jnp.float32)    # (N, N) additive mask, f32 math
    has_edge = has_edge_ref[...]                        # (N, 1) f32 {0,1}

    h = _transformer_conv(x_ref[...], neg_mask, has_edge, w1_ref[...], b1_ref[...],
                          heads=heads, head_dim=head_dim, mm_dtype=mm_dtype)
    # TODO(synk): module-level dropout skipped -- eval-mode identity.
    h = _transformer_conv(h.astype(mm_dtype), neg_mask, has_edge, w2_ref[...], b2_ref[...],
                          heads=heads, head_dim=head_dim, mm_dtype=mm_dtype)
    out = jnp.dot(h.astype(mm_dtype), wfc_ref[...],
                  preferred_element_type=jnp.float32) + bfc_ref[...]      # (N, F_pad) f32
    o_ref[...] = out.astype(o_ref.dtype)                                  # lane-dense store


@functools.partial(jax.jit, static_argnames=("heads", "head_dim", "mm_dtype"))
def graph_transformer_forward(x, adj, params, *, heads, head_dim, mm_dtype=jnp.bfloat16):
    n = x.shape[0]
    hd = heads * head_dim
    f_out = params["fc"]["w"].shape[1]
    f_pad = max(128, -(-f_out // 128) * 128)     # pad fc output to full 128-lane stores
    wfc = jnp.zeros((hd, f_pad), jnp.float32).at[:, :f_out].set(params["fc"]["w"])
    bfc = jnp.zeros((1, f_pad), jnp.float32).at[:, :f_out].set(params["fc"]["b"])

    # Precompute once, reuse in both conv layers. Mask stored narrow (bf16).
    neg_mask = ((adj - 1.0) * 1e30).astype(jnp.bfloat16)                  # (N, N)
    has_edge = (jnp.sum(adj, axis=1, keepdims=True) > 0).astype(jnp.float32)  # (N, 1)

    args = (x.astype(mm_dtype), neg_mask, has_edge,
            params["conv1"]["w"].astype(mm_dtype), params["conv1"]["b"],
            params["conv2"]["w"].astype(mm_dtype), params["conv2"]["b"],
            wfc.astype(mm_dtype), bfc)

    kernel = functools.partial(_graph_transformer_kernel, heads=heads,
                               head_dim=head_dim, mm_dtype=mm_dtype)
    out = pl.pallas_call(
        kernel,
        grid=(1,),
        in_specs=[_full_spec(a.shape) for a in args],
        out_specs=_full_spec((n, f_pad)),
        out_shape=jax.ShapeDtypeStruct((n, f_pad), jnp.float32),
    )(*args)
    return out[:, :f_out]


def _init_linear(key, fan_in, fan_out):
    kw, kb = jax.random.split(key)
    bound = 1.0 / math.sqrt(fan_in)
    w = jax.random.uniform(kw, (fan_in, fan_out), jnp.float32, -bound, bound)
    b = jax.random.uniform(kb, (1, fan_out), jnp.float32, -bound, bound)
    return w, b


def _init_conv(key, in_dim, heads, hidden):
    out_dim = heads * hidden
    kq, kk, kv, ks = jax.random.split(key, 4)
    wq, bq = _init_linear(kq, in_dim, out_dim)
    wk, bk = _init_linear(kk, in_dim, out_dim)
    wv, bv = _init_linear(kv, in_dim, out_dim)
    ws, bs = _init_linear(ks, in_dim, out_dim)
    # fused [q | k | v | skip] along output dim -> single matmul in the kernel
    return dict(w=jnp.concatenate([wq, wk, wv, ws], axis=1),
                b=jnp.concatenate([bq, bk, bv, bs], axis=1))


if __name__ == "__main__":
    N = 16                   # number of graph nodes
    num_node_features = 16
    hidden_channels = 8
    num_heads = 4

    key = jax.random.PRNGKey(0)
    kx, k1, k2, k3 = jax.random.split(key, 4)

    # node features
    x = jax.random.normal(kx, (N, num_node_features), jnp.float32)

    # deterministic edge_index [2, E]: bidirectional ring graph
    src_fwd = jnp.arange(N, dtype=jnp.int32)
    dst_fwd = (src_fwd + 1) % N
    edge_index = jnp.stack([jnp.concatenate([src_fwd, dst_fwd]),
                            jnp.concatenate([dst_fwd, src_fwd])], axis=0)  # (2, 2N)

    # dense adjacency mask: adj[dst, src] = 1
    adj = jnp.zeros((N, N), jnp.float32).at[edge_index[1], edge_index[0]].set(1.0)

    params = {
        "conv1": _init_conv(k1, num_node_features, num_heads, hidden_channels),
        "conv2": _init_conv(k2, hidden_channels * num_heads, num_heads, hidden_channels),
    }
    fw, fb = _init_linear(k3, hidden_channels * num_heads, num_node_features)
    params["fc"] = dict(w=fw, b=fb)

    out = graph_transformer_forward(x, adj, params, heads=num_heads,
                                    head_dim=hidden_channels, mm_dtype=jnp.bfloat16)
    out = jax.block_until_ready(out)
    assert out.shape == (N, num_node_features), out.shape
    assert bool(jnp.all(jnp.isfinite(out)))
    print("KERNEL_OK")
</pallas_src>

<mosaic_0001>
module attributes {stable_mosaic.version = 11 : i64} {
  func.func @_graph_transformer_kernel(%arg0: i32, %arg1: memref<16x16xbf16, #tpu.memory_space<vmem>>, %arg2: memref<16x16xbf16, #tpu.memory_space<vmem>>, %arg3: memref<16x1xf32, #tpu.memory_space<vmem>>, %arg4: memref<16x128xbf16, #tpu.memory_space<vmem>>, %arg5: memref<1x128xf32, #tpu.memory_space<vmem>>, %arg6: memref<32x128xbf16, #tpu.memory_space<vmem>>, %arg7: memref<1x128xf32, #tpu.memory_space<vmem>>, %arg8: memref<32x128xbf16, #tpu.memory_space<vmem>>, %arg9: memref<1x128xf32, #tpu.memory_space<vmem>>, %arg10: memref<16x128xf32, #tpu.memory_space<vmem>>) attributes {dimension_semantics = [#tpu.dimension_semantics<arbitrary>], iteration_bounds = array<i64: 1>, scalar_prefetch = 0 : i64, scratch_operands = 0 : i64, tpu.core_type = #tpu.core_type<tc>, window_params = [{pipeline_mode = #tpu.pipeline_mode<synchronous>, transform_indices = @transform_0, window_bounds = array<i64: 16, 16>}, {pipeline_mode = #tpu.pipeline_mode<synchronous>, transform_indices = @transform_1, window_bounds = array<i64: 16, 16>}, {pipeline_mode = #tpu.pipeline_mode<synchronous>, transform_indices = @transform_2, window_bounds = array<i64: 16, 1>}, {pipeline_mode = #tpu.pipeline_mode<synchronous>, transform_indices = @transform_3, window_bounds = array<i64: 16, 128>}, {pipeline_mode = #tpu.pipeline_mode<synchronous>, transform_indices = @transform_4, window_bounds = array<i64: 1, 128>}, {pipeline_mode = #tpu.pipeline_mode<synchronous>, transform_indices = @transform_5, window_bounds = array<i64: 32, 128>}, {pipeline_mode = #tpu.pipeline_mode<synchronous>, transform_indices = @transform_6, window_bounds = array<i64: 1, 128>}, {pipeline_mode = #tpu.pipeline_mode<synchronous>, transform_indices = @transform_7, window_bounds = array<i64: 32, 128>}, {pipeline_mode = #tpu.pipeline_mode<synchronous>, transform_indices = @transform_8, window_bounds = array<i64: 1, 128>}, {pipeline_mode = #tpu.pipeline_mode<synchronous>, transform_indices = @transform_9, window_bounds = array<i64: 16, 128>}]} {
    %c0 = arith.constant 0 : index
    %c0_0 = arith.constant 0 : index
    %0 = vector.load %arg2[%c0, %c0_0] : memref<16x16xbf16, #tpu.memory_space<vmem>>, vector<16x16xbf16>
    %1 = arith.extf %0 : vector<16x16xbf16> to vector<16x16xf32>
    %c0_1 = arith.constant 0 : index
    %c0_2 = arith.constant 0 : index
    %2 = vector.load %arg3[%c0_1, %c0_2] : memref<16x1xf32, #tpu.memory_space<vmem>>, vector<16x1xf32>
    %c0_3 = arith.constant 0 : index
    %c0_4 = arith.constant 0 : index
    %3 = vector.load %arg1[%c0_3, %c0_4] : memref<16x16xbf16, #tpu.memory_space<vmem>>, vector<16x16xbf16>
    %c0_5 = arith.constant 0 : index
    %c0_6 = arith.constant 0 : index
    %4 = vector.load %arg4[%c0_5, %c0_6] : memref<16x128xbf16, #tpu.memory_space<vmem>>, vector<16x128xbf16>
    %c0_7 = arith.constant 0 : index
    %c0_8 = arith.constant 0 : index
    %5 = vector.load %arg5[%c0_7, %c0_8] : memref<1x128xf32, #tpu.memory_space<vmem>>, vector<1x128xf32>
    %cst = arith.constant dense<0.000000e+00> : vector<16x128xf32>
    %6 = tpu.matmul %3, %4, %cst {dimension_numbers = #tpu.dot_dimension_numbers<[1], [0], [0], [1], [0, 0, 1, 1], [], []>} : vector<16x16xbf16>, vector<16x128xbf16>, vector<16x128xf32> -> vector<16x128xf32>
    %7 = vector.broadcast %5 : vector<1x128xf32> to vector<16x128xf32>
    %8 = arith.addf %6, %7 : vector<16x128xf32>
    %9 = vector.extract_strided_slice %8 {offsets = [0, 0], sizes = [16, 8], strides = [1, 1]} : vector<16x128xf32> to vector<16x8xf32>
    %10 = vector.extract_strided_slice %8 {offsets = [0, 8], sizes = [16, 8], strides = [1, 1]} : vector<16x128xf32> to vector<16x8xf32>
    %11 = vector.extract_strided_slice %8 {offsets = [0, 16], sizes = [16, 8], strides = [1, 1]} : vector<16x128xf32> to vector<16x8xf32>
    %12 = vector.extract_strided_slice %8 {offsets = [0, 24], sizes = [16, 8], strides = [1, 1]} : vector<16x128xf32> to vector<16x8xf32>
    %13 = vector.shape_cast %9 : vector<16x8xf32> to vector<1x16x8xf32>
    %14 = vector.shape_cast %10 : vector<16x8xf32> to vector<1x16x8xf32>
    %15 = vector.shape_cast %11 : vector<16x8xf32> to vector<1x16x8xf32>
    %16 = vector.shape_cast %12 : vector<16x8xf32> to vector<1x16x8xf32>
    %17 = tpu.concatenate %13, %14, %15, %16 in 0 : vector<1x16x8xf32>, vector<1x16x8xf32>, vector<1x16x8xf32>, vector<1x16x8xf32> -> vector<4x16x8xf32>
    %cst_9 = arith.constant 0.353553385 : f32
    %18 = vector.broadcast %cst_9 : f32 to vector<4x16x8xf32>
    %19 = arith.mulf %17, %18 : vector<4x16x8xf32>
    %20 = vector.extract_strided_slice %8 {offsets = [0, 32], sizes = [16, 8], strides = [1, 1]} : vector<16x128xf32> to vector<16x8xf32>
    %21 = vector.extract_strided_slice %8 {offsets = [0, 40], sizes = [16, 8], strides = [1, 1]} : vector<16x128xf32> to vector<16x8xf32>
    %22 = vector.extract_strided_slice %8 {offsets = [0, 48], sizes = [16, 8], strides = [1, 1]} : vector<16x128xf32> to vector<16x8xf32>
    %23 = vector.extract_strided_slice %8 {offsets = [0, 56], sizes = [16, 8], strides = [1, 1]} : vector<16x128xf32> to vector<16x8xf32>
    %24 = vector.shape_cast %20 : vector<16x8xf32> to vector<1x16x8xf32>
    %25 = vector.shape_cast %21 : vector<16x8xf32> to vector<1x16x8xf32>
    %26 = vector.shape_cast %22 : vector<16x8xf32> to vector<1x16x8xf32>
    %27 = vector.shape_cast %23 : vector<16x8xf32> to vector<1x16x8xf32>
    %28 = tpu.concatenate %24, %25, %26, %27 in 0 : vector<1x16x8xf32>, vector<1x16x8xf32>, vector<1x16x8xf32>, vector<1x16x8xf32> -> vector<4x16x8xf32>
    %29 = vector.extract_strided_slice %8 {offsets = [0, 64], sizes = [16, 8], strides = [1, 1]} : vector<16x128xf32> to vector<16x8xf32>
    %30 = vector.extract_strided_slice %8 {offsets = [0, 72], sizes = [16, 8], strides = [1, 1]} : vector<16x128xf32> to vector<16x8xf32>
    %31 = vector.extract_strided_slice %8 {offsets = [0, 80], sizes = [16, 8], strides = [1, 1]} : vector<16x128xf32> to vector<16x8xf32>
    %32 = vector.extract_strided_slice %8 {offsets = [0, 88], sizes = [16, 8], strides = [1, 1]} : vector<16x128xf32> to vector<16x8xf32>
    %33 = vector.shape_cast %29 : vector<16x8xf32> to vector<1x16x8xf32>
    %34 = vector.shape_cast %30 : vector<16x8xf32> to vector<1x16x8xf32>
    %35 = vector.shape_cast %31 : vector<16x8xf32> to vector<1x16x8xf32>
    %36 = vector.shape_cast %32 : vector<16x8xf32> to vector<1x16x8xf32>
    %37 = tpu.concatenate %33, %34, %35, %36 in 0 : vector<1x16x8xf32>, vector<1x16x8xf32>, vector<1x16x8xf32>, vector<1x16x8xf32> -> vector<4x16x8xf32>
    %38 = vector.extract_strided_slice %8 {offsets = [0, 96], sizes = [16, 32], strides = [1, 1]} : vector<16x128xf32> to vector<16x32xf32>
    %39 = arith.truncf %19 : vector<4x16x8xf32> to vector<4x16x8xbf16>
    %40 = arith.truncf %28 : vector<4x16x8xf32> to vector<4x16x8xbf16>
    "tpu.trace_start"() <{level = 10 : i32, message = "hnd,hmd->hnm"}> : () -> ()
    %cst_10 = arith.constant dense<0.000000e+00> : vector<4x16x16xf32>
    %41 = tpu.matmul %39, %40, %cst_10 {dimension_numbers = #tpu.dot_dimension_numbers<[2], [2], [1], [1], [0, 0, 0, 1, 1, 1], [0], [0]>} : vector<4x16x8xbf16>, vector<4x16x8xbf16>, vector<4x16x16xf32> -> vector<4x16x16xf32>
    "tpu.trace_stop"() : () -> ()
    %42 = vector.shape_cast %1 : vector<16x16xf32> to vector<1x16x16xf32>
    %43 = vector.broadcast %42 : vector<1x16x16xf32> to vector<4x16x16xf32>
    %44 = arith.addf %41, %43 : vector<4x16x16xf32>
    %cst_11 = arith.constant dense<0xFF800000> : vector<4x16xf32>
    %45 = vector.multi_reduction <maximumf>, %44, %cst_11 [2] : vector<4x16x16xf32> to vector<4x16xf32>
    %46 = vector.shape_cast %45 : vector<4x16xf32> to vector<4x16x1xf32>
    %47 = vector.broadcast %46 : vector<4x16x1xf32> to vector<4x16x16xf32>
    %48 = arith.subf %44, %47 : vector<4x16x16xf32>
    %49 = math.exp %48 : vector<4x16x16xf32>
    %cst_12 = arith.constant dense<0.000000e+00> : vector<4x16xf32>
    %50 = vector.multi_reduction <add>, %49, %cst_12 [2] : vector<4x16x16xf32> to vector<4x16xf32>
    %51 = vector.shape_cast %50 : vector<4x16xf32> to vector<4x16x1xf32>
    %52 = tpu.reciprocal %51 {approx = true} : vector<4x16x1xf32> -> vector<4x16x1xf32>
    %53 = vector.broadcast %52 : vector<4x16x1xf32> to vector<4x16x16xf32>
    %54 = arith.mulf %49, %53 : vector<4x16x16xf32>
    %55 = arith.truncf %54 : vector<4x16x16xf32> to vector<4x16x16xbf16>
    %56 = arith.truncf %37 : vector<4x16x8xf32> to vector<4x16x8xbf16>
    "tpu.trace_start"() <{level = 10 : i32, message = "hnm,hmd->hnd"}> : () -> ()
    %cst_13 = arith.constant dense<0.000000e+00> : vector<4x16x8xf32>
    %57 = tpu.matmul %55, %56, %cst_13 {dimension_numbers = #tpu.dot_dimension_numbers<[2], [1], [1], [2], [0, 0, 0, 1, 1, 2], [0], [0]>} : vector<4x16x16xbf16>, vector<4x16x8xbf16>, vector<4x16x8xf32> -> vector<4x16x8xf32>
    "tpu.trace_stop"() : () -> ()
    %58 = vector.extract_strided_slice %57 {offsets = [0, 0, 0], sizes = [1, 16, 8], strides = [1, 1, 1]} : vector<4x16x8xf32> to vector<1x16x8xf32>
    %59 = vector.shape_cast %58 : vector<1x16x8xf32> to vector<16x8xf32>
    %60 = vector.extract_strided_slice %57 {offsets = [1, 0, 0], sizes = [1, 16, 8], strides = [1, 1, 1]} : vector<4x16x8xf32> to vector<1x16x8xf32>
    %61 = vector.shape_cast %60 : vector<1x16x8xf32> to vector<16x8xf32>
    %62 = vector.extract_strided_slice %57 {offsets = [2, 0, 0], sizes = [1, 16, 8], strides = [1, 1, 1]} : vector<4x16x8xf32> to vector<1x16x8xf32>
    %63 = vector.shape_cast %62 : vector<1x16x8xf32> to vector<16x8xf32>
    %64 = vector.extract_strided_slice %57 {offsets = [3, 0, 0], sizes = [1, 16, 8], strides = [1, 1, 1]} : vector<4x16x8xf32> to vector<1x16x8xf32>
    %65 = vector.shape_cast %64 : vector<1x16x8xf32> to vector<16x8xf32>
    %66 = tpu.concatenate %59, %61, %63, %65 in 1 : vector<16x8xf32>, vector<16x8xf32>, vector<16x8xf32>, vector<16x8xf32> -> vector<16x32xf32>
    %67 = vector.broadcast %2 : vector<16x1xf32> to vector<16x32xf32>
    %68 = arith.mulf %66, %67 : vector<16x32xf32>
    %69 = arith.addf %68, %38 : vector<16x32xf32>
    %cst_14 = arith.constant 0.000000e+00 : f32
    %70 = vector.broadcast %cst_14 : f32 to vector<16x32xf32>
    %71 = arith.maximumf %69, %70 : vector<16x32xf32>
    %72 = arith.truncf %71 : vector<16x32xf32> to vector<16x32xbf16>
    %c0_15 = arith.constant 0 : index
    %c0_16 = arith.constant 0 : index
    %73 = vector.load %arg6[%c0_15, %c0_16] : memref<32x128xbf16, #tpu.memory_space<vmem>>, vector<32x128xbf16>
    %c0_17 = arith.constant 0 : index
    %c0_18 = arith.constant 0 : index
    %74 = vector.load %arg7[%c0_17, %c0_18] : memref<1x128xf32, #tpu.memory_space<vmem>>, vector<1x128xf32>
    %cst_19 = arith.constant dense<0.000000e+00> : vector<16x128xf32>
    %75 = tpu.matmul %72, %73, %cst_19 {dimension_numbers = #tpu.dot_dimension_numbers<[1], [0], [0], [1], [0, 0, 1, 1], [], []>} : vector<16x32xbf16>, vector<32x128xbf16>, vector<16x128xf32> -> vector<16x128xf32>
    %76 = vector.broadcast %74 : vector<1x128xf32> to vector<16x128xf32>
    %77 = arith.addf %75, %76 : vector<16x128xf32>
    %78 = vector.extract_strided_slice %77 {offsets = [0, 0], sizes = [16, 8], strides = [1, 1]} : vector<16x128xf32> to vector<16x8xf32>
    %79 = vector.extract_strided_slice %77 {offsets = [0, 8], sizes = [16, 8], strides = [1, 1]} : vector<16x128xf32> to vector<16x8xf32>
    %80 = vector.extract_strided_slice %77 {offsets = [0, 16], sizes = [16, 8], strides = [1, 1]} : vector<16x128xf32> to vector<16x8xf32>
    %81 = vector.extract_strided_slice %77 {offsets = [0, 24], sizes = [16, 8], strides = [1, 1]} : vector<16x128xf32> to vector<16x8xf32>
    %82 = vector.shape_cast %78 : vector<16x8xf32> to vector<1x16x8xf32>
    %83 = vector.shape_cast %79 : vector<16x8xf32> to vector<1x16x8xf32>
    %84 = vector.shape_cast %80 : vector<16x8xf32> to vector<1x16x8xf32>
    %85 = vector.shape_cast %81 : vector<16x8xf32> to vector<1x16x8xf32>
    %86 = tpu.concatenate %82, %83, %84, %85 in 0 : vector<1x16x8xf32>, vector<1x16x8xf32>, vector<1x16x8xf32>, vector<1x16x8xf32> -> vector<4x16x8xf32>
    %cst_20 = arith.constant 0.353553385 : f32
    %87 = vector.broadcast %cst_20 : f32 to vector<4x16x8xf32>
    %88 = arith.mulf %86, %87 : vector<4x16x8xf32>
    %89 = vector.extract_strided_slice %77 {offsets = [0, 32], sizes = [16, 8], strides = [1, 1]} : vector<16x128xf32> to vector<16x8xf32>
    %90 = vector.extract_strided_slice %77 {offsets = [0, 40], sizes = [16, 8], strides = [1, 1]} : vector<16x128xf32> to vector<16x8xf32>
    %91 = vector.extract_strided_slice %77 {offsets = [0, 48], sizes = [16, 8], strides = [1, 1]} : vector<16x128xf32> to vector<16x8xf32>
    %92 = vector.extract_strided_slice %77 {offsets = [0, 56], sizes = [16, 8], strides = [1, 1]} : vector<16x128xf32> to vector<16x8xf32>
    %93 = vector.shape_cast %89 : vector<16x8xf32> to vector<1x16x8xf32>
    %94 = vector.shape_cast %90 : vector<16x8xf32> to vector<1x16x8xf32>
    %95 = vector.shape_cast %91 : vector<16x8xf32> to vector<1x16x8xf32>
    %96 = vector.shape_cast %92 : vector<16x8xf32> to vector<1x16x8xf32>
    %97 = tpu.concatenate %93, %94, %95, %96 in 0 : vector<1x16x8xf32>, vector<1x16x8xf32>, vector<1x16x8xf32>, vector<1x16x8xf32> -> vector<4x16x8xf32>
    %98 = vector.extract_strided_slice %77 {offsets = [0, 64], sizes = [16, 8], strides = [1, 1]} : vector<16x128xf32> to vector<16x8xf32>
    %99 = vector.extract_strided_slice %77 {offsets = [0, 72], sizes = [16, 8], strides = [1, 1]} : vector<16x128xf32> to vector<16x8xf32>
    %100 = vector.extract_strided_slice %77 {offsets = [0, 80], sizes = [16, 8], strides = [1, 1]} : vector<16x128xf32> to vector<16x8xf32>
    %101 = vector.extract_strided_slice %77 {offsets = [0, 88], sizes = [16, 8], strides = [1, 1]} : vector<16x128xf32> to vector<16x8xf32>
    %102 = vector.shape_cast %98 : vector<16x8xf32> to vector<1x16x8xf32>
    %103 = vector.shape_cast %99 : vector<16x8xf32> to vector<1x16x8xf32>
    %104 = vector.shape_cast %100 : vector<16x8xf32> to vector<1x16x8xf32>
    %105 = vector.shape_cast %101 : vector<16x8xf32> to vector<1x16x8xf32>
    %106 = tpu.concatenate %102, %103, %104, %105 in 0 : vector<1x16x8xf32>, vector<1x16x8xf32>, vector<1x16x8xf32>, vector<1x16x8xf32> -> vector<4x16x8xf32>
    %107 = vector.extract_strided_slice %77 {offsets = [0, 96], sizes = [16, 32], strides = [1, 1]} : vector<16x128xf32> to vector<16x32xf32>
    %108 = arith.truncf %88 : vector<4x16x8xf32> to vector<4x16x8xbf16>
    %109 = arith.truncf %97 : vector<4x16x8xf32> to vector<4x16x8xbf16>
    "tpu.trace_start"() <{level = 10 : i32, message = "hnd,hmd->hnm"}> : () -> ()
    %cst_21 = arith.constant dense<0.000000e+00> : vector<4x16x16xf32>
    %110 = tpu.matmul %108, %109, %cst_21 {dimension_numbers = #tpu.dot_dimension_numbers<[2], [2], [1], [1], [0, 0, 0, 1, 1, 1], [0], [0]>} : vector<4x16x8xbf16>, vector<4x16x8xbf16>, vector<4x16x16xf32> -> vector<4x16x16xf32>
    "tpu.trace_stop"() : () -> ()
    %111 = vector.shape_cast %1 : vector<16x16xf32> to vector<1x16x16xf32>
    %112 = vector.broadcast %111 : vector<1x16x16xf32> to vector<4x16x16xf32>
    %113 = arith.addf %110, %112 : vector<4x16x16xf32>
    %cst_22 = arith.constant dense<0xFF800000> : vector<4x16xf32>
    %114 = vector.multi_reduction <maximumf>, %113, %cst_22 [2] : vector<4x16x16xf32> to vector<4x16xf32>
    %115 = vector.shape_cast %114 : vector<4x16xf32> to vector<4x16x1xf32>
    %116 = vector.broadcast %115 : vector<4x16x1xf32> to vector<4x16x16xf32>
    %117 = arith.subf %113, %116 : vector<4x16x16xf32>
    %118 = math.exp %117 : vector<4x16x16xf32>
    %cst_23 = arith.constant dense<0.000000e+00> : vector<4x16xf32>
    %119 = vector.multi_reduction <add>, %118, %cst_23 [2] : vector<4x16x16xf32> to vector<4x16xf32>
    %120 = vector.shape_cast %119 : vector<4x16xf32> to vector<4x16x1xf32>
    %121 = tpu.reciprocal %120 {approx = true} : vector<4x16x1xf32> -> vector<4x16x1xf32>
    %122 = vector.broadcast %121 : vector<4x16x1xf32> to vector<4x16x16xf32>
    %123 = arith.mulf %118, %122 : vector<4x16x16xf32>
    %124 = arith.truncf %123 : vector<4x16x16xf32> to vector<4x16x16xbf16>
    %125 = arith.truncf %106 : vector<4x16x8xf32> to vector<4x16x8xbf16>
    "tpu.trace_start"() <{level = 10 : i32, message = "hnm,hmd->hnd"}> : () -> ()
    %cst_24 = arith.constant dense<0.000000e+00> : vector<4x16x8xf32>
    %126 = tpu.matmul %124, %125, %cst_24 {dimension_numbers = #tpu.dot_dimension_numbers<[2], [1], [1], [2], [0, 0, 0, 1, 1, 2], [0], [0]>} : vector<4x16x16xbf16>, vector<4x16x8xbf16>, vector<4x16x8xf32> -> vector<4x16x8xf32>
    "tpu.trace_stop"() : () -> ()
    %127 = vector.extract_strided_slice %126 {offsets = [0, 0, 0], sizes = [1, 16, 8], strides = [1, 1, 1]} : vector<4x16x8xf32> to vector<1x16x8xf32>
    %128 = vector.shape_cast %127 : vector<1x16x8xf32> to vector<16x8xf32>
    %129 = vector.extract_strided_slice %126 {offsets = [1, 0, 0], sizes = [1, 16, 8], strides = [1, 1, 1]} : vector<4x16x8xf32> to vector<1x16x8xf32>
    %130 = vector.shape_cast %129 : vector<1x16x8xf32> to vector<16x8xf32>
    %131 = vector.extract_strided_slice %126 {offsets = [2, 0, 0], sizes = [1, 16, 8], strides = [1, 1, 1]} : vector<4x16x8xf32> to vector<1x16x8xf32>
    %132 = vector.shape_cast %131 : vector<1x16x8xf32> to vector<16x8xf32>
    %133 = vector.extract_strided_slice %126 {offsets = [3, 0, 0], sizes = [1, 16, 8], strides = [1, 1, 1]} : vector<4x16x8xf32> to vector<1x16x8xf32>
    %134 = vector.shape_cast %133 : vector<1x16x8xf32> to vector<16x8xf32>
    %135 = tpu.concatenate %128, %130, %132, %134 in 1 : vector<16x8xf32>, vector<16x8xf32>, vector<16x8xf32>, vector<16x8xf32> -> vector<16x32xf32>
    %136 = vector.broadcast %2 : vector<16x1xf32> to vector<16x32xf32>
    %137 = arith.mulf %135, %136 : vector<16x32xf32>
    %138 = arith.addf %137, %107 : vector<16x32xf32>
    %cst_25 = arith.constant 0.000000e+00 : f32
    %139 = vector.broadcast %cst_25 : f32 to vector<16x32xf32>
    %140 = arith.maximumf %138, %139 : vector<16x32xf32>
    %141 = arith.truncf %140 : vector<16x32xf32> to vector<16x32xbf16>
    %c0_26 = arith.constant 0 : index
    %c0_27 = arith.constant 0 : index
    %142 = vector.load %arg8[%c0_26, %c0_27] : memref<32x128xbf16, #tpu.memory_space<vmem>>, vector<32x128xbf16>
    %cst_28 = arith.constant dense<0.000000e+00> : vector<16x128xf32>
    %143 = tpu.matmul %141, %142, %cst_28 {dimension_numbers = #tpu.dot_dimension_numbers<[1], [0], [0], [1], [0, 0, 1, 1], [], []>} : vector<16x32xbf16>, vector<32x128xbf16>, vector<16x128xf32> -> vector<16x128xf32>
    %c0_29 = arith.constant 0 : index
    %c0_30 = arith.constant 0 : index
    %144 = vector.load %arg9[%c0_29, %c0_30] : memref<1x128xf32, #tpu.memory_space<vmem>>, vector<1x128xf32>
    %145 = vector.broadcast %144 : vector<1x128xf32> to vector<16x128xf32>
    %146 = arith.addf %143, %145 : vector<16x128xf32>
    %c0_31 = arith.constant 0 : index
    %c0_32 = arith.constant 0 : index
    %147 = vector.load %arg10[%c0_31, %c0_32] : memref<16x128xf32, #tpu.memory_space<vmem>>, vector<16x128xf32>
    tpu.vector_store %arg10[%c0_31, %c0_32], %146 {strides = array<i32>} : memref<16x128xf32, #tpu.memory_space<vmem>>, vector<16x128xf32>,
    return
  }
  func.func @transform_0(%arg0: i32) -> (i32, i32) {
    %c0_i32 = arith.constant 0 : i32
    %c0_i32_0 = arith.constant 0 : i32
    %c0_i32_1 = arith.constant 0 : i32
    return %c0_i32, %c0_i32_0 : i32, i32
  }
  func.func @transform_1(%arg0: i32) -> (i32, i32) {
    %c0_i32 = arith.constant 0 : i32
    %c0_i32_0 = arith.constant 0 : i32
    %c0_i32_1 = arith.constant 0 : i32
    return %c0_i32, %c0_i32_0 : i32, i32
  }
  func.func @transform_2(%arg0: i32) -> (i32, i32) {
    %c0_i32 = arith.constant 0 : i32
    %c0_i32_0 = arith.constant 0 : i32
    %c0_i32_1 = arith.constant 0 : i32
    return %c0_i32, %c0_i32_0 : i32, i32
  }
  func.func @transform_3(%arg0: i32) -> (i32, i32) {
    %c0_i32 = arith.constant 0 : i32
    %c0_i32_0 = arith.constant 0 : i32
    %c0_i32_1 = arith.constant 0 : i32
    return %c0_i32, %c0_i32_0 : i32, i32
  }
  func.func @transform_4(%arg0: i32) -> (i32, i32) {
    %c0_i32 = arith.constant 0 : i32
    %c0_i32_0 = arith.constant 0 : i32
    %c0_i32_1 = arith.constant 0 : i32
    return %c0_i32, %c0_i32_0 : i32, i32
  }
  func.func @transform_5(%arg0: i32) -> (i32, i32) {
    %c0_i32 = arith.constant 0 : i32
    %c0_i32_0 = arith.constant 0 : i32
    %c0_i32_1 = arith.constant 0 : i32
    return %c0_i32, %c0_i32_0 : i32, i32
  }
  func.func @transform_6(%arg0: i32) -> (i32, i32) {
    %c0_i32 = arith.constant 0 : i32
    %c0_i32_0 = arith.constant 0 : i32
    %c0_i32_1 = arith.constant 0 : i32
    return %c0_i32, %c0_i32_0 : i32, i32
  }
  func.func @transform_7(%arg0: i32) -> (i32, i32) {
    %c0_i32 = arith.constant 0 : i32
    %c0_i32_0 = arith.constant 0 : i32
    %c0_i32_1 = arith.constant 0 : i32
    return %c0_i32, %c0_i32_0 : i32, i32
  }
  func.func @transform_8(%arg0: i32) -> (i32, i32) {
    %c0_i32 = arith.constant 0 : i32
    %c0_i32_0 = arith.constant 0 : i32
    %c0_i32_1 = arith.constant 0 : i32
    return %c0_i32, %c0_i32_0 : i32, i32
  }
  func.func @transform_9(%arg0: i32) -> (i32, i32) {
    %c0_i32 = arith.constant 0 : i32
    %c0_i32_0 = arith.constant 0 : i32
    %c0_i32_1 = arith.constant 0 : i32
    return %c0_i32, %c0_i32_0 : i32, i32
  }
}

</mosaic_0001>

<bundles_post_ra>
// kernel: graph_transformer_forward.1
= control target key start
LH: loop header
LB: loop body
LE: loop exit
PB: predicated region body
PF: predicated region fallthrough
CT: control target
= control target key end

     0   :  { %v1690_v1 = vmov 0.0   ;;  %vm1691_vm0 = vmmov 0   ;;  %vm62_vm1 = vcmask 130048   ;;  %s2077_s0 = inlined_call_operand.vmem [shape: bf16[16,16], index: 0, kind: input, shape index: {}]   ;;  %s2078_s1 = inlined_call_operand.vmem [shape: bf16[16,16], index: 1, kind: input, shape index: {}]   ;;  %s2079_s2 = inlined_call_operand.vmem [shape: f32[16,1], index: 2, kind: input, shape index: {}]   ;;  %s2080_s3 = inlined_call_operand.vmem [shape: bf16[16,128], index: 3, kind: input, shape index: {}]   ;;  %s2081_s4 = inlined_call_operand.vmem [shape: f32[1,128], index: 4, kind: input, shape index: {}]   ;;  %s2082_s5 = inlined_call_operand.vmem [shape: bf16[32,128], index: 5, kind: input, shape index: {}]   ;;  %s2083_s6 = inlined_call_operand.vmem [shape: f32[1,128], index: 6, kind: input, shape index: {}]   ;;  %s2084_s7 = inlined_call_operand.vmem [shape: bf16[32,128], index: 7, kind: input, shape index: {}]   ;;  %s2085_s8 = inlined_call_operand.vmem [shape: f32[1,128], index: 8, kind: input, shape index: {}]   ;;  %s2086_s9 = inlined_call_operand.hbm [shape: f32[16,128], index: 9, kind: output, shape index: {}]  }
   0x1   :  { %v1596_v0 = vld [vmem:[%s2080_s3] sm:$0xff]   ;;  %1462 = vmatprep.subr.bf16.mxu0 %v1690_v1  ;;  %1468 = vmatprep.subr.bf16.mxu1 %v1690_v1 }
   0x2   :  { %v1597_v2 = vld [vmem:[%s2077_s0] sm:$0xff]   ;;  %1463 = vmatpush3.bf16.msra.mxu0 %v1596_v0  ;;  %1464 = vmatprep.mubr.msk.bf16.mxu0 %vm1691_vm0, %v1690_v1 }
   0x3   :  { %1470 = vmatprep.mubr.msk.bf16.mxu1 %vm1691_vm0, %v1690_v1  ;;  %1474 = vmatprep.subr.bf16.mxu0 %v1690_v1 }
   0x5   :  { %1465 = vmatmul.mubr.msk.bf16.vlgmr.msra.gmra.mrb[0].mxu0 %vm62_vm1, %v1597_v2 }
   0x6   :  { %14 = vsyncpa [#allocation3], 0  ;;  %1476 = vmatprep.mubr.msk.bf16.mxu0 %vm1691_vm0, %v1690_v1  ;;  %v1390_v3 = vld [vmem:[%s2081_s4] ss:$0 sm:$0xff]  ;;  %s1692_s13 = smov 112   ;;  %s1693_s14 = smov 120  }
   0x7   :  { %s1694_s4 = smov 104   ;;  %s1695_s15 = smov 96   ;;  %vm146_vm2 = vcmask 64512   ;;  %v1419_v40 = vld [vmem:[%s2078_s1] sm:$0xff]   ;;  %vm652_vm3 = vcmask 195584   ;;  %vm701_vm4 = vcmask 261120  }
   0x8   :  { %v1832_v41 = vunpack.c.l.bf16 %v1419_v40  ;;  %v1834_v42 = vunpack.c.h.bf16 %v1419_v40  ;;  %s1696_s1 = smov 64   ;;  %s1698_s23 = smov 8  }
   0x9   :  { %s1699_s26 = smov 16   ;;  %s1700_s27 = smov 24  }
   0xa   :  { %s1702_s0 = smov [#allocation2]  }
   0xb   :  { %s1379_s3 = sshll.u32 %s1702_s0, 4  ;;  %s1380_s3 = int_to_ptr.vmem [resolvable:$true] %s1379_s3 }
   0xc   :  { %p1671_p1 = scmp.lt.s32.totalorder %s1380_s3, %s1380_s3 }
  0xd8   :  { %v100_v4 = vpop.f32.mrb[0].mxu0 }
  0xd9   :  { %v1773_v5 = vadd.f32 %v1390_v3, %v100_v4  ;;  %v1466_v6 = vpop.f32.mrb[1].mxu0 }
  0xda   :  { %v103_v7 = vpop.f32.mrb[2].mxu0 }
  0xdb   :  { %115 = vrot.lane.b32.xlu1 %v1773_v5, %s1692_s13  ;;  %109 = vrot.lane.b32.xlu0 %v1773_v5, %s1693_s14  ;;  %v1467_v8 = vpop.f32.mrb[3].mxu0  ;;  %v1779_v9 = vadd.f32 %v1390_v3, %v103_v7  ;;  %v127_v29 = vmul.f32 0.35355338, %v1773_v5 }
  0xdd   :  { %v1791_v10 = vpack.c.bf16 %v1779_v9, %v1773_v5  ;;  %v128_v28 = vmul.f32 0.35355338, %v1779_v9 }
  0xdf   :  { %117 = vrot.lane.b32.xlu1 %v1779_v9, %s1692_s13  ;;  %111 = vrot.lane.b32.xlu0 %v1779_v9, %s1693_s14  ;;  %v135_v30 = vpack.c.bf16 %v128_v28, %v127_v29 }
  0xe3   :  { %123 = vrot.lane.b32.xlu1 %v1779_v9, %s1694_s4  ;;  %121 = vrot.lane.b32.xlu0 %v1773_v5, %s1694_s4 }
  0xe7   :  { %144 = vrot.lane.b32.xlu0 %v1791_v10, %s1695_s15 }
 0x14d   :  { %v116_v11 = vpop.permute.xlu1 %115  ;;  %v110_v12 = vpop.permute.xlu0 %109 }
 0x14e   :  { %v131_v13 = vmul.f32 0.35355338, %v116_v11  ;;  %v129_v14 = vmul.f32 0.35355338, %v110_v12 }
 0x151   :  { %v118_v15 = vpop.permute.xlu1 %117  ;;  %v112_v16 = vpop.permute.xlu0 %111 }
 0x152   :  { %v132_v17 = vmul.f32 0.35355338, %v118_v15  ;;  %v1795_v18 = vpack.c.bf16 %v118_v15, %v116_v11  ;;  %v130_v19 = vmul.f32 0.35355338, %v112_v16  ;;  %v1797_v20 = vpack.c.bf16 %v112_v16, %v110_v12 }
 0x154   :  { %v137_v21 = vpack.c.bf16 %v132_v17, %v131_v13  ;;  %v136_v22 = vpack.c.bf16 %v130_v19, %v129_v14  ;;  %195 = vrot.lane.b32.xlu1 %v1797_v20, %s1695_s15  ;;  %245 = vrot.lane.b32.xlu0 %v1795_v18, %s1695_s15 }
 0x155   :  { %v124_v23 = vpop.permute.xlu1 %123  ;;  %v122_v24 = vpop.permute.xlu0 %121 }
 0x156   :  { %v1803_v25 = vpack.c.bf16 %v124_v23, %v122_v24  ;;  %v134_v37 = vmul.f32 0.35355338, %v124_v23  ;;  %v133_v38 = vmul.f32 0.35355338, %v122_v24 }
 0x158   :  { %295 = vrot.lane.b32.xlu1 %v1803_v25, %s1695_s15  ;;  %v138_v39 = vpack.c.bf16 %v134_v37, %v133_v38 }
 0x159   :  { %v145_v26 = vpop.permute.xlu0 %144 }
 0x15a   :  { %v151_v27 = vsel %vm146_vm2, %v145_v26, 0 }
 0x15b   :  { %1469 = vmatpush3.bf16.xpose.msra.mxu1 %v151_v27 }
 0x15c   :  { %1480 = vmatprep.subr.bf16.mxu1 %v1690_v1 }
 0x162   :  { %1471 = vmatmul.mubr.msk.bf16.vlgmr.msra.gmra.mrb[0].mxu1 %vm146_vm2, %v135_v30 }
 0x163   :  { %1482 = vmatprep.mubr.msk.bf16.mxu1 %vm1691_vm0, %v1690_v1 }
 0x1c6   :  { %v196_v31 = vpop.permute.xlu1 %195  ;;  %v246_v32 = vpop.permute.xlu0 %245 }
 0x1c7   :  { %v201_v33 = vsel %vm146_vm2, %v196_v31, 0  ;;  %v251_v34 = vsel %vm146_vm2, %v246_v32, 0 }
 0x1c8   :  { %1475 = vmatpush3.bf16.xpose.msra.mxu0 %v201_v33  ;;  %1481 = vmatpush3.bf16.xpose.msra.mxu1 %v251_v34 }
 0x1c9   :  { %1486 = vmatprep.subr.bf16.mxu0 %v1690_v1  ;;  %1492 = vmatprep.subr.bf16.mxu1 %v1690_v1 }
 0x1ca   :  { %v296_v35 = vpop.permute.xlu1 %295 }
 0x1cb   :  { %v301_v36 = vsel %vm146_vm2, %v296_v35, 0 }
 0x1cf   :  { %1477 = vmatmul.mubr.msk.bf16.vlgmr.msra.gmra.mrb[4].mxu0 %vm146_vm2, %v136_v22  ;;  %1483 = vmatmul.mubr.msk.bf16.vlgmr.msra.gmra.mrb[4].mxu1 %vm146_vm2, %v137_v21 }
 0x1d0   :  { %1487 = vmatpush3.bf16.xpose.msra.mxu0 %v301_v36  ;;  %1488 = vmatprep.mubr.msk.bf16.mxu0 %vm1691_vm0, %v1690_v1 }
 0x1d1   :  { %1494 = vmatprep.mubr.msk.bf16.mxu1 %vm1691_vm0, %v1690_v1  ;;  %1498 = vmatprep.subr.bf16.mxu0 %v1690_v1 }
 0x1d7   :  { %1489 = vmatmul.mubr.msk.bf16.vlgmr.msra.gmra.mrb[8].mxu0 %vm146_vm2, %v138_v39 }
 0x1d8   :  { %1500 = vmatprep.mubr.msk.bf16.mxu0 %vm1691_vm0, %v1690_v1 }
 0x235   :  { %v187_v43 = vpop.f32.mrb[0].mxu1 }
 0x236   :  { %v188_v44 = vadd.f32 %v1832_v41, %v187_v43  ;;  %v1472_v45 = vpop.f32.mrb[1].mxu1 }
 0x237   :  { %v190_v46 = vpop.f32.mrb[2].mxu1 }
 0x238   :  { %v191_v47 = vadd.f32 %v1834_v42, %v190_v46  ;;  %v1473_v48 = vpop.f32.mrb[3].mxu1  ;;  %v344_v49 = vsel %vm62_vm1, %v188_v44, -inf }
 0x239   :  { %345 = vmax.xlane.f32.xlu0 %v344_v49 }
 0x23a   :  { %v347_v50 = vsel %vm62_vm1, %v191_v47, -inf }
 0x23b   :  { %348 = vmax.xlane.f32.xlu1 %v347_v50 }
 0x2a2   :  { %v237_v51 = vpop.f32.mrb[4].mxu0  ;;  %v287_v52 = vpop.f32.mrb[4].mxu1 }
 0x2a3   :  { %v238_v53 = vadd.f32 %v1832_v41, %v237_v51  ;;  %v288_v54 = vadd.f32 %v1832_v41, %v287_v52  ;;  %v1478_v55 = vpop.f32.mrb[5].mxu0  ;;  %v1484_v56 = vpop.f32.mrb[5].mxu1 }
 0x2a4   :  { %v240_v57 = vpop.f32.mrb[6].mxu0  ;;  %v290_v58 = vpop.f32.mrb[6].mxu1 }
 0x2a5   :  { %v241_v59 = vadd.f32 %v1834_v42, %v240_v57  ;;  %v1479_v60 = vpop.f32.mrb[7].mxu0  ;;  %v1485_v61 = vpop.f32.mrb[7].mxu1  ;;  %v356_v62 = vsel %vm62_vm1, %v288_v54, -inf  ;;  %v350_v63 = vsel %vm62_vm1, %v238_v53, -inf  ;;  %v291_v0 = vadd.f32 %v1834_v42, %v290_v58 }
 0x2a6   :  { %357 = vmax.xlane.f32.xlu1 %v356_v62  ;;  %351 = vmax.xlane.f32.xlu0 %v350_v63 }
 0x2a7   :  { %v353_v2 = vsel %vm62_vm1, %v241_v59, -inf  ;;  %v359_v13 = vsel %vm62_vm1, %v291_v0, -inf }
 0x2aa   :  { %v337_v3 = vpop.f32.mrb[8].mxu0  ;;  %354 = vmax.xlane.f32.xlu0 %v353_v2 }
 0x2ab   :  { %v338_v4 = vadd.f32 %v1832_v41, %v337_v3  ;;  %v1490_v6 = vpop.f32.mrb[9].mxu0 }
 0x2ac   :  { %v340_v7 = vpop.f32.mrb[10].mxu0  ;;  %v38_v6 = vld [vmem:[%s2079_s2] sm:$0xff] }
 0x2ad   :  { %v341_v8 = vadd.f32 %v1834_v42, %v340_v7  ;;  %v1491_v11 = vpop.f32.mrb[11].mxu0  ;;  %v362_v12 = vsel %vm62_vm1, %v338_v4, -inf  ;;  %v1697_v7 = vmov 0  }
 0x2ae   :  { %363 = vmax.xlane.f32.xlu1 %v362_v12  ;;  %360 = vmax.xlane.f32.xlu0 %v359_v13 }
 0x2af   :  { %v365_v14 = vsel %vm62_vm1, %v341_v8, -inf  ;;  %1595 = vset.pattern.permute.xlu1 %v1697_v7  ;;  %1594 = vset.pattern.permute.xlu0 %v1697_v7 }
 0x2b2   :  { %366 = vmax.xlane.f32.xlu0 %v365_v14 }
 0x2bf   :  { %436 = vrot.lane.b32.xlu1 %v1791_v10, %s1696_s1 }
 0x2c6   :  { %v346_v17 = vpop.xlane.xlu0 %345 }
 0x2c7   :  { %v368_v21 = vsub.f32 %v188_v44, %v346_v17 }
 0x2c8   :  { %v349_v15 = vpop.xlane.xlu1 %348 }
 0x2c9   :  { %v369_v16 = vsub.f32 %v191_v47, %v349_v15  ;;  %v376_v22 = vmul.f32 1.442695, %v368_v21 }
 0x2cb   :  { %v378_v19 = vmul.f32 1.442695, %v369_v16 }
 0x2cd   :  { %1602 = vpow2.f32 %v378_v19 }
 0x2ce   :  { %1604 = vpow2.f32 %v376_v22 }
 0x2d7   :  { %v1603_v23 = vpop.eup %1602 }
 0x2d8   :  { %v395_v24 = vsel %vm62_vm1, %v1603_v23, 0.0  ;;  %v1605_v26 = vpop.eup %1604 }
 0x2d9   :  { %396 = vadd.xlane.f32.xlu0 %v395_v24  ;;  %v392_v27 = vsel %vm62_vm1, %v1605_v26, 0.0 }
 0x2e3   :  { %393 = vadd.xlane.f32.xlu1 %v392_v27 }
 0x333   :  { %v358_v28 = vpop.xlane.xlu1 %357  ;;  %v352_v29 = vpop.xlane.xlu0 %351 }
 0x334   :  { %v372_v30 = vsub.f32 %v288_v54, %v358_v28  ;;  %v370_v10 = vsub.f32 %v238_v53, %v352_v29 }
 0x336   :  { %v380_v31 = vmul.f32 1.442695, %v370_v10  ;;  %v384_v32 = vmul.f32 1.442695, %v372_v30 }
 0x337   :  { %v355_v33 = vpop.xlane.xlu0 %354 }
 0x338   :  { %v371_v34 = vsub.f32 %v241_v59, %v355_v33  ;;  %1606 = vpow2.f32 %v380_v31 }
 0x339   :  { %1608 = vpow2.f32 %v384_v32 }
 0x33a   :  { %v382_v35 = vmul.f32 1.442695, %v371_v34 }
 0x33b   :  { %v364_v36 = vpop.xlane.xlu1 %363  ;;  %v361_v37 = vpop.xlane.xlu0 %360 }
 0x33c   :  { %1610 = vpow2.f32 %v382_v35  ;;  %v374_v38 = vsub.f32 %v338_v4, %v364_v36  ;;  %v373_v39 = vsub.f32 %v291_v0, %v361_v37 }
 0x33e   :  { %v388_v40 = vmul.f32 1.442695, %v374_v38  ;;  %v386_v43 = vmul.f32 1.442695, %v373_v39  ;;  %v1598_v38 = vld [vmem:[%s2082_s5] sm:$0xff]  }
 0x33f   :  { %v437_v44 = vpop.permute.xlu1 %436  ;;  %v367_v45 = vpop.xlane.xlu0 %366 }
 0x340   :  { %1612 = vpow2.f32 %v388_v40  ;;  %v375_v46 = vsub.f32 %v341_v8, %v367_v45  ;;  %1493 = vmatpush3.bf16.msra.mxu1 %v437_v44  ;;  %v1599_v44 = vld [vmem:[%s2082_s5 + $0x8] sm:$0xff]   ;;  %s1701_s5 = smov 32  }
 0x341   :  { %1614 = vpow2.f32 %v386_v43  ;;  %1504 = vmatprep.subr.bf16.mxu1 %v1690_v1 }
 0x342   :  { %v390_v47 = vmul.f32 1.442695, %v375_v46  ;;  %v1607_v48 = vpop.eup %1606 }
 0x343   :  { %v398_v49 = vsel %vm62_vm1, %v1607_v48, 0.0  ;;  %v1858_v50 = vpop.eup %1608 }
 0x344   :  { %1616 = vpow2.f32 %v390_v47  ;;  %399 = vadd.xlane.f32.xlu1 %v398_v49  ;;  %v404_v53 = vsel %vm62_vm1, %v1858_v50, 0.0 }
 0x346   :  { %v1611_v51 = vpop.eup %1610 }
 0x347   :  { %v401_v52 = vsel %vm62_vm1, %v1611_v51, 0.0 }
 0x348   :  { %402 = vadd.xlane.f32.xlu0 %v401_v52  ;;  %405 = vadd.xlane.f32.xlu1 %v404_v53 }
 0x34a   :  { %v1863_v54 = vpop.eup %1612 }
 0x34b   :  { %v1615_v55 = vpop.eup %1614  ;;  %v410_v56 = vsel %vm62_vm1, %v1863_v54, 0.0 }
 0x34c   :  { %v407_v57 = vsel %vm62_vm1, %v1615_v55, 0.0  ;;  %411 = vadd.xlane.f32.xlu1 %v410_v56 }
 0x34d   :  { %408 = vadd.xlane.f32.xlu0 %v407_v57 }
 0x34e   :  { %v1617_v58 = vpop.eup %1616 }
 0x34f   :  { %v413_v59 = vsel %vm62_vm1, %v1617_v58, 0.0 }
 0x351   :  { %414 = vadd.xlane.f32.xlu0 %v413_v59 }
 0x35d   :  { %530 = vrot.lane.b32.xlu1 %v1795_v18, %s1696_s1 }
 0x361   :  { %577 = vrot.lane.b32.xlu1 %v1803_v25, %s1696_s1 }
 0x366   :  { %v397_v60 = vpop.xlane.xlu0 %396 }
 0x367   :  { %483 = vrot.lane.b32.xlu0 %v1797_v20, %s1696_s1  ;;  %1618 = vrcp.f32 %v397_v60  ;;  %v39_v20 = vld [vmem:[%s2079_s2 + $0x8] sm:$0xff] }
 0x368   :  { %662 = vperm.xlu1 %1595, %v39_v20  }
 0x36b   :  { %657 = vperm.xlu0 %1594, %v38_v6  }
 0x370   :  { %v394_v61 = vpop.xlane.xlu1 %393 }
 0x371   :  { %1620 = vrcp.f32 %v394_v61  ;;  %v1619_v62 = vpop.eup %1618 }
 0x372   :  { %v425_v0 = vmul.f32 %v1619_v62, %v1603_v23 }
 0x37b   :  { %v1621_v63 = vpop.eup %1620 }
 0x37c   :  { %v424_v2 = vmul.f32 %v1621_v63, %v1605_v26 }
 0x37e   :  { %v432_v3 = vpack.c.bf16 %v425_v0, %v424_v2 }
 0x380   :  { %1495 = vmatmul.mubr.msk.bf16.vlgmr.msra.gmra.mrb[8].mxu1 %vm62_vm1, %v432_v3 }
 0x381   :  { %1506 = vmatprep.mubr.msk.bf16.mxu1 %vm1691_vm0, %v1690_v1 }
 0x3d1   :  { %v400_v18 = vpop.xlane.xlu1 %399 }
 0x3d2   :  { %1622 = vrcp.f32 %v400_v18 }
 0x3d5   :  { %v403_v25 = vpop.xlane.xlu0 %402  ;;  %v406_v4 = vpop.xlane.xlu1 %405 }
 0x3d6   :  { %1624 = vrcp.f32 %v403_v25 }
 0x3d7   :  { %1626 = vrcp.f32 %v406_v4 }
 0x3d9   :  { %v412_v8 = vpop.xlane.xlu1 %411 }
 0x3da   :  { %v409_v11 = vpop.xlane.xlu0 %408 }
 0x3db   :  { %1628 = vrcp.f32 %v409_v11  ;;  %v1402_v11 = vld [vmem:[%s2083_s6] ss:$0 sm:$0xff] }
 0x3dc   :  { %1630 = vrcp.f32 %v412_v8  ;;  %v1623_v12 = vpop.eup %1622 }
 0x3dd   :  { %v531_v13 = vpop.permute.xlu1 %530  ;;  %v426_v16 = vmul.f32 %v1623_v12, %v1607_v48 }
 0x3de   :  { %v415_v14 = vpop.xlane.xlu0 %414  ;;  %1505 = vmatpush3.bf16.msra.mxu1 %v531_v13 }
 0x3df   :  { %1632 = vrcp.f32 %v415_v14  ;;  %1516 = vmatprep.subr.bf16.mxu1 %v1690_v1 }
 0x3e0   :  { %v1625_v15 = vpop.eup %1624 }
 0x3e1   :  { %v427_v17 = vmul.f32 %v1625_v15, %v1611_v51  ;;  %v1627_v22 = vpop.eup %1626  ;;  %v578_v24 = vpop.permute.xlu1 %577 }
 0x3e2   :  { %v484_v19 = vpop.permute.xlu0 %483  ;;  %v428_v27 = vmul.f32 %v1627_v22, %v1858_v50 }
 0x3e3   :  { %1499 = vmatpush3.bf16.msra.mxu0 %v484_v19  ;;  %v433_v21 = vpack.c.bf16 %v427_v17, %v426_v16 }
 0x3e4   :  { %1510 = vmatprep.subr.bf16.mxu0 %v1690_v1 }
 0x3e5   :  { %v1629_v23 = vpop.eup %1628 }
 0x3e6   :  { %1501 = vmatmul.mubr.msk.bf16.vlgmr.msra.gmra.mrb[12].mxu0 %vm62_vm1, %v433_v21  ;;  %v1631_v26 = vpop.eup %1630  ;;  %v429_v28 = vmul.f32 %v1629_v23, %v1615_v55 }
 0x3e7   :  { %1511 = vmatpush3.bf16.msra.mxu0 %v578_v24  ;;  %1512 = vmatprep.mubr.msk.bf16.mxu0 %vm1691_vm0, %v1690_v1  ;;  %v430_v10 = vmul.f32 %v1631_v26, %v1863_v54  ;;  %v1916_v53 = vpop.permute.xlu1 %662 }
 0x3e8   :  { %1524 = vmatprep.subr.bf16.mxu0 %v1690_v1  ;;  %v434_v30 = vpack.c.bf16 %v429_v28, %v428_v27 }
 0x3e9   :  { %v1633_v29 = vpop.eup %1632 }
 0x3ea   :  { %v431_v31 = vmul.f32 %v1633_v29, %v1617_v58  ;;  %1507 = vmatmul.mubr.msk.bf16.vlgmr.msra.gmra.mrb[12].mxu1 %vm62_vm1, %v434_v30  ;;  %v1918_v54 = vpop.permute.xlu0 %657 }
 0x3eb   :  { %1520 = vmatprep.mubr.msk.bf16.mxu1 %vm1691_vm0, %v1690_v1  ;;  %1517 = vmatpush3.bf16.msra.mxu1 %v1598_v38 }
 0x3ec   :  { %v435_v32 = vpack.c.bf16 %v431_v31, %v430_v10  ;;  %1518 = vmatprep.subr.bf16.mxu1 %v1690_v1 }
 0x3ee   :  { %1513 = vmatmul.mubr.msk.bf16.vlgmr.msra.gmra.mrb[16].mxu0 %vm62_vm1, %v435_v32 }
 0x3ef   :  { %1526 = vmatprep.mubr.msk.bf16.mxu0 %vm1691_vm0, %v1690_v1  ;;  %1519 = vmatpush3.bf16.msra.mxu1 %v1599_v44 }
 0x3f0   :  { %1530 = vmatprep.subr.bf16.mxu1 %v1690_v1 }
 0x453   :  { %v476_v33 = vpop.f32.mrb[8].mxu1 }
 0x454   :  { %v1496_v34 = vpop.f32.mrb[9].mxu1 }
 0x455   :  { %v479_v35 = vpop.f32.mrb[10].mxu1 }
 0x456   :  { %v1497_v36 = vpop.f32.mrb[11].mxu1 }
 0x4b9   :  { %v523_v37 = vpop.f32.mrb[12].mxu0 }
 0x4ba   :  { %626 = vrot.lane.b32.xlu1 %v523_v37, %s1698_s23  ;;  %v1502_v39 = vpop.f32.mrb[13].mxu0 }
 0x4bb   :  { %v526_v40 = vpop.f32.mrb[14].mxu0 }
 0x4bc   :  { %628 = vrot.lane.b32.xlu0 %v526_v40, %s1698_s23  ;;  %v1503_v43 = vpop.f32.mrb[15].mxu0 }
 0x4bd   :  { %v570_v45 = vpop.f32.mrb[12].mxu1 }
 0x4be   :  { %v1508_v46 = vpop.f32.mrb[13].mxu1  ;;  %634 = vrot.lane.b32.xlu1 %v570_v45, %s1699_s26 }
 0x4bf   :  { %v573_v47 = vpop.f32.mrb[14].mxu1 }
 0x4c0   :  { %v1509_v48 = vpop.f32.mrb[15].mxu1  ;;  %636 = vrot.lane.b32.xlu0 %v573_v47, %s1699_s26 }
 0x4c1   :  { %v617_v49 = vpop.f32.mrb[16].mxu0 }
 0x4c2   :  { %v1514_v50 = vpop.f32.mrb[17].mxu0  ;;  %642 = vrot.lane.b32.xlu1 %v617_v49, %s1700_s27 }
 0x4c3   :  { %v620_v51 = vpop.f32.mrb[18].mxu0 }
 0x4c4   :  { %v1515_v52 = vpop.f32.mrb[19].mxu0  ;;  %644 = vrot.lane.b32.xlu0 %v620_v51, %s1700_s27 }
 0x4c6   :  { %667 = vrot.lane.b32.xlu1 %v1773_v5, %s1701_s5 }
 0x4c8   :  { %669 = vrot.lane.b32.xlu0 %v1779_v9, %s1701_s5 }
 0x52c   :  { %v627_v55 = vpop.permute.xlu1 %626 }
 0x52d   :  { %v648_v59 = vsel %vm146_vm2, %v476_v33, %v627_v55 }
 0x52e   :  { %v629_v56 = vpop.permute.xlu0 %628 }
 0x52f   :  { %v649_v62 = vsel %vm146_vm2, %v479_v35, %v629_v56 }
 0x530   :  { %v635_v57 = vpop.permute.xlu1 %634 }
 0x531   :  { %v650_v60 = vsel %vm62_vm1, %v648_v59, %v635_v57 }
 0x532   :  { %v637_v58 = vpop.permute.xlu0 %636 }
 0x533   :  { %v651_v9 = vsel %vm62_vm1, %v649_v62, %v637_v58 }
 0x534   :  { %v643_v61 = vpop.permute.xlu1 %642 }
 0x535   :  { %v653_v5 = vsel %vm652_vm3, %v650_v60, %v643_v61 }
 0x536   :  { %v645_v63 = vpop.permute.xlu0 %644  ;;  %v665_v0 = vmul.f32 %v1918_v54, %v653_v5 }
 0x537   :  { %v654_v2 = vsel %vm652_vm3, %v651_v9, %v645_v63 }
 0x538   :  { %v668_v3 = vpop.permute.xlu1 %667  ;;  %v666_v18 = vmul.f32 %v1916_v53, %v654_v2 }
 0x539   :  { %v673_v25 = vadd.f32 %v668_v3, %v665_v0 }
 0x53a   :  { %v670_v4 = vpop.permute.xlu0 %669 }
 0x53b   :  { %v674_v20 = vadd.f32 %v670_v4, %v666_v18  ;;  %v675_v6 = vmax.f32 %v673_v25, 0.0 }
 0x53d   :  { %v676_v7 = vmax.f32 %v674_v20, 0.0 }
 0x53f   :  { %v677_v8 = vpack.c.bf16 %v676_v7, %v675_v6 }
 0x541   :  { %1521 = vmatmul.mubr.msk.bf16.vlgmr.msra.gmra.mrb[16].mxu1 %vm701_vm4, %v677_v8 }
 0x542   :  { %1532 = vmatprep.mubr.msk.bf16.mxu1 %vm1691_vm0, %v1690_v1 }
 0x614   :  { %v739_v12 = vpop.f32.mrb[16].mxu1 }
 0x615   :  { %v1934_v13 = vadd.f32 %v1402_v11, %v739_v12  ;;  %v1522_v14 = vpop.f32.mrb[17].mxu1 }
 0x616   :  { %v742_v15 = vpop.f32.mrb[18].mxu1 }
 0x617   :  { %v1936_v16 = vadd.f32 %v1402_v11, %v742_v15  ;;  %748 = vrot.lane.b32.xlu1 %v1934_v13, %s1693_s14  ;;  %v1523_v17 = vpop.f32.mrb[19].mxu1  ;;  %v766_v39 = vmul.f32 0.35355338, %v1934_v13 }
 0x619   :  { %750 = vrot.lane.b32.xlu0 %v1936_v16, %s1693_s14  ;;  %v1952_v19 = vpack.c.bf16 %v1936_v16, %v1934_v13  ;;  %v767_v38 = vmul.f32 0.35355338, %v1936_v16 }
 0x61b   :  { %754 = vrot.lane.b32.xlu1 %v1934_v13, %s1692_s13  ;;  %v774_v40 = vpack.c.bf16 %v767_v38, %v766_v39 }
 0x61d   :  { %756 = vrot.lane.b32.xlu0 %v1936_v16, %s1692_s13  ;;  %s1666_s13 = scalar_lea.vmem %s1380_s3, 256 }
 0x61e   :  { %p1667_p0 = scmp.ne.s32.totalorder %s1380_s3, %s1666_s13  ;;  %p1672_p2 = scmp.lt.s32.totalorder %s1666_s13, %s1666_s13 }
 0x61f   :  { %760 = vrot.lane.b32.xlu1 %v1934_v13, %s1694_s4 }
 0x620   :  { %p1673_p3 = por %p1672_p2, %p1671_p1 }
 0x621   :  { %762 = vrot.lane.b32.xlu0 %v1936_v16, %s1694_s4 }
 0x622   :  { %p1674_p4 = pnand %p1673_p3, %p1667_p0 }
 0x623   :  { %783 = vrot.lane.b32.xlu1 %v1952_v19, %s1695_s15 }
 0x689   :  { %v749_v21 = vpop.permute.xlu1 %748 }
 0x68a   :  { %v768_v23 = vmul.f32 0.35355338, %v749_v21 }
 0x68b   :  { %v751_v22 = vpop.permute.xlu0 %750 }
 0x68c   :  { %v769_v24 = vmul.f32 0.35355338, %v751_v22  ;;  %v1956_v26 = vpack.c.bf16 %v751_v22, %v749_v21 }
 0x68d   :  { %v755_v27 = vpop.permute.xlu1 %754 }
 0x68e   :  { %v775_v28 = vpack.c.bf16 %v769_v24, %v768_v23  ;;  %833 = vrot.lane.b32.xlu0 %v1956_v26, %s1695_s15  ;;  %v770_v30 = vmul.f32 0.35355338, %v755_v27 }
 0x68f   :  { %v757_v29 = vpop.permute.xlu0 %756 }
 0x690   :  { %v771_v10 = vmul.f32 0.35355338, %v757_v29  ;;  %v1960_v31 = vpack.c.bf16 %v757_v29, %v755_v27 }
 0x691   :  { %v761_v32 = vpop.permute.xlu1 %760 }
 0x692   :  { %v776_v33 = vpack.c.bf16 %v771_v10, %v770_v30  ;;  %883 = vrot.lane.b32.xlu1 %v1960_v31, %s1695_s15  ;;  %v772_v50 = vmul.f32 0.35355338, %v761_v32 }
 0x693   :  { %v763_v34 = vpop.permute.xlu0 %762 }
 0x694   :  { %v1964_v35 = vpack.c.bf16 %v763_v34, %v761_v32  ;;  %v773_v49 = vmul.f32 0.35355338, %v763_v34 }
 0x695   :  { %v784_v36 = vpop.permute.xlu1 %783 }
 0x696   :  { %v789_v37 = vsel %vm146_vm2, %v784_v36, 0  ;;  %933 = vrot.lane.b32.xlu0 %v1964_v35, %s1695_s15  ;;  %v777_v51 = vpack.c.bf16 %v773_v49, %v772_v50 }
 0x697   :  { %1525 = vmatpush3.bf16.xpose.msra.mxu0 %v789_v37 }
 0x698   :  { %1536 = vmatprep.subr.bf16.mxu0 %v1690_v1 }
 0x69e   :  { %1527 = vmatmul.mubr.msk.bf16.vlgmr.msra.gmra.mrb[20].mxu0 %vm146_vm2, %v774_v40 }
 0x69f   :  { %1538 = vmatprep.mubr.msk.bf16.mxu0 %vm1691_vm0, %v1690_v1 }
 0x700   :  { %v834_v43 = vpop.permute.xlu0 %833 }
 0x701   :  { %v839_v44 = vsel %vm146_vm2, %v834_v43, 0 }
 0x702   :  { %1531 = vmatpush3.bf16.xpose.msra.mxu1 %v839_v44 }
 0x703   :  { %1542 = vmatprep.subr.bf16.mxu1 %v1690_v1 }
 0x704   :  { %v884_v45 = vpop.permute.xlu1 %883 }
 0x705   :  { %v889_v46 = vsel %vm146_vm2, %v884_v45, 0 }
 0x706   :  { %1537 = vmatpush3.bf16.xpose.msra.mxu0 %v889_v46 }
 0x707   :  { %1548 = vmatprep.subr.bf16.mxu0 %v1690_v1 }
 0x708   :  { %v934_v47 = vpop.permute.xlu0 %933 }
 0x709   :  { %v939_v48 = vsel %vm146_vm2, %v934_v47, 0  ;;  %1533 = vmatmul.mubr.msk.bf16.vlgmr.msra.gmra.mrb[20].mxu1 %vm146_vm2, %v775_v28 }
 0x70a   :  { %1543 = vmatpush3.bf16.xpose.msra.mxu1 %v939_v48  ;;  %1544 = vmatprep.mubr.msk.bf16.mxu1 %vm1691_vm0, %v1690_v1 }
 0x70b   :  { %1554 = vmatprep.subr.bf16.mxu1 %v1690_v1 }
 0x70d   :  { %1539 = vmatmul.mubr.msk.bf16.vlgmr.msra.gmra.mrb[24].mxu0 %vm146_vm2, %v776_v33 }
 0x70e   :  { %1550 = vmatprep.mubr.msk.bf16.mxu0 %vm1691_vm0, %v1690_v1 }
 0x711   :  { %1545 = vmatmul.mubr.msk.bf16.vlgmr.msra.gmra.mrb[24].mxu1 %vm146_vm2, %v777_v51 }
 0x712   :  { %1556 = vmatprep.mubr.msk.bf16.mxu1 %vm1691_vm0, %v1690_v1 }
 0x771   :  { %v825_v52 = vpop.f32.mrb[20].mxu0 }
 0x772   :  { %v826_v55 = vadd.f32 %v1832_v41, %v825_v52  ;;  %v1528_v56 = vpop.f32.mrb[21].mxu0 }
 0x773   :  { %v828_v57 = vpop.f32.mrb[22].mxu0 }
 0x774   :  { %v829_v58 = vadd.f32 %v1834_v42, %v828_v57  ;;  %v1529_v59 = vpop.f32.mrb[23].mxu0  ;;  %v982_v60 = vsel %vm62_vm1, %v826_v55, -inf }
 0x775   :  { %983 = vmax.xlane.f32.xlu1 %v982_v60 }
 0x776   :  { %v985_v61 = vsel %vm62_vm1, %v829_v58, -inf }
 0x777   :  { %986 = vmax.xlane.f32.xlu0 %v985_v61 }
 0x7dc   :  { %v875_v62 = vpop.f32.mrb[20].mxu1 }
 0x7dd   :  { %v876_v5 = vadd.f32 %v1832_v41, %v875_v62  ;;  %v1534_v9 = vpop.f32.mrb[21].mxu1 }
 0x7de   :  { %v878_v63 = vpop.f32.mrb[22].mxu1 }
 0x7df   :  { %v879_v0 = vadd.f32 %v1834_v42, %v878_v63  ;;  %v1535_v2 = vpop.f32.mrb[23].mxu1  ;;  %v988_v3 = vsel %vm62_vm1, %v876_v5, -inf }
 0x7e0   :  { %v925_v18 = vpop.f32.mrb[24].mxu0  ;;  %989 = vmax.xlane.f32.xlu0 %v988_v3 }
 0x7e1   :  { %v926_v25 = vadd.f32 %v1832_v41, %v925_v18  ;;  %v1540_v4 = vpop.f32.mrb[25].mxu0  ;;  %v991_v20 = vsel %vm62_vm1, %v879_v0, -inf }
 0x7e2   :  { %v928_v6 = vpop.f32.mrb[26].mxu0  ;;  %992 = vmax.xlane.f32.xlu1 %v991_v20 }
 0x7e3   :  { %v929_v7 = vadd.f32 %v1834_v42, %v928_v6  ;;  %v1541_v8 = vpop.f32.mrb[27].mxu0  ;;  %v994_v11 = vsel %vm62_vm1, %v926_v25, -inf }
 0x7e4   :  { %995 = vmax.xlane.f32.xlu0 %v994_v11  ;;  %v975_v12 = vpop.f32.mrb[24].mxu1 }
 0x7e5   :  { %v976_v14 = vadd.f32 %v1832_v41, %v975_v12  ;;  %v1546_v15 = vpop.f32.mrb[25].mxu1  ;;  %v997_v17 = vsel %vm62_vm1, %v929_v7, -inf }
 0x7e6   :  { %998 = vmax.xlane.f32.xlu1 %v997_v17  ;;  %v978_v21 = vpop.f32.mrb[26].mxu1 }
 0x7e7   :  { %v979_v22 = vadd.f32 %v1834_v42, %v978_v21  ;;  %v1547_v23 = vpop.f32.mrb[27].mxu1  ;;  %v1000_v24 = vsel %vm62_vm1, %v976_v14, -inf }
 0x7e8   :  { %1001 = vmax.xlane.f32.xlu0 %v1000_v24 }
 0x7e9   :  { %v1003_v27 = vsel %vm62_vm1, %v979_v22, -inf }
 0x7ea   :  { %1004 = vmax.xlane.f32.xlu1 %v1003_v27 }
 0x7fb   :  { %1121 = vrot.lane.b32.xlu1 %v1956_v26, %s1696_s1 }
 0x7fe   :  { %1074 = vrot.lane.b32.xlu0 %v1952_v19, %s1696_s1 }
 0x802   :  { %v984_v41 = vpop.xlane.xlu1 %983 }
 0x803   :  { %v1006_v29 = vsub.f32 %v826_v55, %v984_v41 }
 0x804   :  { %v987_v28 = vpop.xlane.xlu0 %986 }
 0x805   :  { %v1007_v30 = vsub.f32 %v829_v58, %v987_v28  ;;  %v1014_v10 = vmul.f32 1.442695, %v1006_v29 }
 0x807   :  { %v1016_v32 = vmul.f32 1.442695, %v1007_v30  ;;  %1634 = vpow2.f32 %v1014_v10 }
 0x809   :  { %1636 = vpow2.f32 %v1016_v32 }
 0x811   :  { %v1635_v42 = vpop.eup %1634 }
 0x812   :  { %v1030_v34 = vsel %vm62_vm1, %v1635_v42, 0.0 }
 0x813   :  { %v1637_v33 = vpop.eup %1636 }
 0x814   :  { %v1033_v36 = vsel %vm62_vm1, %v1637_v33, 0.0 }
 0x81d   :  { %1031 = vadd.xlane.f32.xlu0 %v1030_v34 }
 0x81f   :  { %1034 = vadd.xlane.f32.xlu1 %v1033_v36 }
 0x86d   :  { %v990_v26 = vpop.xlane.xlu0 %989 }
 0x86e   :  { %v1008_v37 = vsub.f32 %v876_v5, %v990_v26 }
 0x86f   :  { %v993_v38 = vpop.xlane.xlu1 %992 }
 0x870   :  { %v1018_v19 = vmul.f32 1.442695, %v1008_v37  ;;  %v1009_v39 = vsub.f32 %v879_v0, %v993_v38 }
 0x871   :  { %v996_v40 = vpop.xlane.xlu0 %995 }
 0x872   :  { %1638 = vpow2.f32 %v1018_v19  ;;  %v1020_v43 = vmul.f32 1.442695, %v1009_v39  ;;  %v1010_v44 = vsub.f32 %v926_v25, %v996_v40 }
 0x873   :  { %v999_v45 = vpop.xlane.xlu1 %998 }
 0x874   :  { %1640 = vpow2.f32 %v1020_v43  ;;  %v1022_v46 = vmul.f32 1.442695, %v1010_v44  ;;  %v1011_v47 = vsub.f32 %v929_v7, %v999_v45  ;;  %v1600_v45 = vld [vmem:[%s2084_s7] sm:$0xff]  }
 0x875   :  { %v1002_v48 = vpop.xlane.xlu0 %1001 }
 0x876   :  { %1642 = vpow2.f32 %v1022_v46  ;;  %v1024_v49 = vmul.f32 1.442695, %v1011_v47  ;;  %v1012_v50 = vsub.f32 %v976_v14, %v1002_v48 }
 0x877   :  { %v1005_v51 = vpop.xlane.xlu1 %1004 }
 0x878   :  { %1644 = vpow2.f32 %v1024_v49  ;;  %v1026_v52 = vmul.f32 1.442695, %v1012_v50  ;;  %v1013_v55 = vsub.f32 %v979_v22, %v1005_v51  ;;  %v1601_v50 = vld [vmem:[%s2084_s7 + $0x8] sm:$0xff]  }
 0x879   :  { %v1075_v56 = vpop.permute.xlu0 %1074 }
 0x87a   :  { %1646 = vpow2.f32 %v1026_v52  ;;  %v1028_v57 = vmul.f32 1.442695, %v1013_v55  ;;  %1549 = vmatpush3.bf16.msra.mxu0 %v1075_v56 }
 0x87b   :  { %v1122_v58 = vpop.permute.xlu1 %1121  ;;  %1560 = vmatprep.subr.bf16.mxu0 %v1690_v1 }
 0x87c   :  { %v1639_v59 = vpop.eup %1638  ;;  %1648 = vpow2.f32 %v1028_v57  ;;  %1555 = vmatpush3.bf16.msra.mxu1 %v1122_v58 }
 0x87d   :  { %v1036_v60 = vsel %vm62_vm1, %v1639_v59, 0.0  ;;  %1566 = vmatprep.subr.bf16.mxu1 %v1690_v1 }
 0x87e   :  { %v1641_v61 = vpop.eup %1640  ;;  %1037 = vadd.xlane.f32.xlu0 %v1036_v60 }
 0x87f   :  { %v1039_v62 = vsel %vm62_vm1, %v1641_v61, 0.0 }
 0x880   :  { %v1643_v5 = vpop.eup %1642  ;;  %1040 = vadd.xlane.f32.xlu1 %v1039_v62 }
 0x881   :  { %v1042_v9 = vsel %vm62_vm1, %v1643_v5, 0.0 }
 0x882   :  { %v1645_v63 = vpop.eup %1644  ;;  %1043 = vadd.xlane.f32.xlu0 %v1042_v9 }
 0x883   :  { %v1045_v0 = vsel %vm62_vm1, %v1645_v63, 0.0 }
 0x884   :  { %v1647_v2 = vpop.eup %1646  ;;  %1046 = vadd.xlane.f32.xlu1 %v1045_v0 }
 0x885   :  { %v1048_v3 = vsel %vm62_vm1, %v1647_v2, 0.0 }
 0x886   :  { %v1649_v18 = vpop.eup %1648  ;;  %1049 = vadd.xlane.f32.xlu0 %v1048_v3 }
 0x887   :  { %v1051_v25 = vsel %vm62_vm1, %v1649_v18, 0.0 }
 0x888   :  { %1052 = vadd.xlane.f32.xlu1 %v1051_v25 }
 0x899   :  { %1168 = vrot.lane.b32.xlu1 %v1960_v31, %s1696_s1 }
 0x89c   :  { %1215 = vrot.lane.b32.xlu0 %v1964_v35, %s1696_s1 }
 0x8aa   :  { %v1032_v4 = vpop.xlane.xlu0 %1031 }
 0x8ab   :  { %1650 = vrcp.f32 %v1032_v4 }
 0x8ac   :  { %v1035_v20 = vpop.xlane.xlu1 %1034 }
 0x8ad   :  { %1652 = vrcp.f32 %v1035_v20 }
 0x8b5   :  { %v1651_v6 = vpop.eup %1650 }
 0x8b6   :  { %v1062_v8 = vmul.f32 %v1651_v6, %v1635_v42 }
 0x8b7   :  { %v1653_v7 = vpop.eup %1652 }
 0x8b8   :  { %v1063_v11 = vmul.f32 %v1653_v7, %v1637_v33 }
 0x8ba   :  { %v1070_v12 = vpack.c.bf16 %v1063_v11, %v1062_v8 }
 0x8bc   :  { %1551 = vmatmul.mubr.msk.bf16.vlgmr.msra.gmra.mrb[28].mxu0 %vm62_vm1, %v1070_v12 }
 0x8bd   :  { %1562 = vmatprep.mubr.msk.bf16.mxu0 %vm1691_vm0, %v1690_v1 }
 0x90b   :  { %v1038_v14 = vpop.xlane.xlu0 %1037 }
 0x90c   :  { %1654 = vrcp.f32 %v1038_v14  ;;  %v1414_v14 = vld [vmem:[%s2085_s8] ss:$0 sm:$0xff] }
 0x90d   :  { %v1041_v31 = vpop.xlane.xlu1 %1040 }
 0x90e   :  { %1656 = vrcp.f32 %v1041_v31 }
 0x90f   :  { %v1044_v15 = vpop.xlane.xlu0 %1043 }
 0x910   :  { %1658 = vrcp.f32 %v1044_v15 }
 0x911   :  { %v1047_v35 = vpop.xlane.xlu1 %1046 }
 0x912   :  { %1660 = vrcp.f32 %v1047_v35 }
 0x913   :  { %v1050_v17 = vpop.xlane.xlu0 %1049 }
 0x914   :  { %1662 = vrcp.f32 %v1050_v17 }
 0x915   :  { %v1053_v21 = vpop.xlane.xlu1 %1052 }
 0x916   :  { %v1655_v22 = vpop.eup %1654  ;;  %1664 = vrcp.f32 %v1053_v21 }
 0x917   :  { %v1064_v24 = vmul.f32 %v1655_v22, %v1639_v59  ;;  %v1216_v42 = vpop.permute.xlu0 %1215 }
 0x918   :  { %v1657_v23 = vpop.eup %1656 }
 0x919   :  { %v1065_v27 = vmul.f32 %v1657_v23, %v1641_v61  ;;  %v1169_v41 = vpop.permute.xlu1 %1168 }
 0x91a   :  { %v1659_v28 = vpop.eup %1658  ;;  %1561 = vmatpush3.bf16.msra.mxu0 %v1169_v41 }
 0x91b   :  { %v1071_v29 = vpack.c.bf16 %v1065_v27, %v1064_v24  ;;  %1572 = vmatprep.subr.bf16.mxu0 %v1690_v1  ;;  %v1066_v10 = vmul.f32 %v1659_v28, %v1643_v5 }
 0x91c   :  { %v1661_v30 = vpop.eup %1660 }
 0x91d   :  { %v1067_v32 = vmul.f32 %v1661_v30, %v1645_v63  ;;  %1557 = vmatmul.mubr.msk.bf16.vlgmr.msra.gmra.mrb[28].mxu1 %vm62_vm1, %v1071_v29 }
 0x91e   :  { %v1663_v33 = vpop.eup %1662  ;;  %1567 = vmatpush3.bf16.msra.mxu1 %v1216_v42  ;;  %1568 = vmatprep.mubr.msk.bf16.mxu1 %vm1691_vm0, %v1690_v1 }
 0x91f   :  { %v1072_v34 = vpack.c.bf16 %v1067_v32, %v1066_v10  ;;  %v1068_v26 = vmul.f32 %v1663_v33, %v1647_v2 }
 0x920   :  { %v1665_v36 = vpop.eup %1664 }
 0x921   :  { %v1069_v37 = vmul.f32 %v1665_v36, %v1649_v18  ;;  %1563 = vmatmul.mubr.msk.bf16.vlgmr.msra.gmra.mrb[32].mxu0 %vm62_vm1, %v1072_v34 }
 0x922   :  { %1576 = vmatprep.mubr.msk.bf16.mxu0 %vm1691_vm0, %v1690_v1  ;;  %1573 = vmatpush3.bf16.msra.mxu0 %v1600_v45 }
 0x923   :  { %v1073_v38 = vpack.c.bf16 %v1069_v37, %v1068_v26  ;;  %1574 = vmatprep.subr.bf16.mxu0 %v1690_v1 }
 0x925   :  { %1569 = vmatmul.mubr.msk.bf16.vlgmr.msra.gmra.mrb[32].mxu1 %vm62_vm1, %v1073_v38 }
 0x926   :  { %1575 = vmatpush3.bf16.msra.mxu0 %v1601_v50 }
 0x98f   :  { %v1114_v19 = vpop.f32.mrb[28].mxu0 }
 0x990   :  { %v1552_v39 = vpop.f32.mrb[29].mxu0 }
 0x991   :  { %v1117_v40 = vpop.f32.mrb[30].mxu0 }
 0x992   :  { %v1553_v43 = vpop.f32.mrb[31].mxu0 }
 0x9f0   :  { %v1161_v44 = vpop.f32.mrb[28].mxu1 }
 0x9f1   :  { %1264 = vrot.lane.b32.xlu1 %v1161_v44, %s1698_s23  ;;  %v1558_v46 = vpop.f32.mrb[29].mxu1 }
 0x9f2   :  { %v1164_v47 = vpop.f32.mrb[30].mxu1 }
 0x9f3   :  { %1266 = vrot.lane.b32.xlu0 %v1164_v47, %s1698_s23  ;;  %v1559_v48 = vpop.f32.mrb[31].mxu1 }
 0x9f4   :  { %v1208_v49 = vpop.f32.mrb[32].mxu0 }
 0x9f5   :  { %v1564_v51 = vpop.f32.mrb[33].mxu0  ;;  %1272 = vrot.lane.b32.xlu1 %v1208_v49, %s1699_s26 }
 0x9f6   :  { %v1211_v52 = vpop.f32.mrb[34].mxu0 }
 0x9f7   :  { %v1565_v55 = vpop.f32.mrb[35].mxu0  ;;  %1274 = vrot.lane.b32.xlu0 %v1211_v52, %s1699_s26 }
 0x9f8   :  { %v1255_v56 = vpop.f32.mrb[32].mxu1 }
 0x9f9   :  { %1280 = vrot.lane.b32.xlu1 %v1255_v56, %s1700_s27  ;;  %v1570_v57 = vpop.f32.mrb[33].mxu1 }
 0x9fa   :  { %v1258_v58 = vpop.f32.mrb[34].mxu1 }
 0x9fb   :  { %1282 = vrot.lane.b32.xlu0 %v1258_v58, %s1700_s27  ;;  %v1571_v1 = vpop.f32.mrb[35].mxu1 }
 0x9fd   :  { %1294 = vrot.lane.b32.xlu1 %v1934_v13, %s1701_s5 }
 0x9ff   :  { %1296 = vrot.lane.b32.xlu0 %v1936_v16, %s1701_s5 }
 0xa63   :  { %v1265_v59 = vpop.permute.xlu1 %1264 }
 0xa64   :  { %v1286_v5 = vsel %vm146_vm2, %v1114_v19, %v1265_v59 }
 0xa65   :  { %v1267_v60 = vpop.permute.xlu0 %1266 }
 0xa66   :  { %v1287_v0 = vsel %vm146_vm2, %v1117_v40, %v1267_v60 }
 0xa67   :  { %v1273_v61 = vpop.permute.xlu1 %1272 }
 0xa68   :  { %v1288_v9 = vsel %vm62_vm1, %v1286_v5, %v1273_v61 }
 0xa69   :  { %v1275_v62 = vpop.permute.xlu0 %1274 }
 0xa6a   :  { %v1289_v3 = vsel %vm62_vm1, %v1287_v0, %v1275_v62 }
 0xa6b   :  { %v1281_v63 = vpop.permute.xlu1 %1280 }
 0xa6c   :  { %v1290_v2 = vsel %vm652_vm3, %v1288_v9, %v1281_v63 }
 0xa6d   :  { %v1283_v18 = vpop.permute.xlu0 %1282  ;;  %v1292_v13 = vmul.f32 %v1290_v2, %v1918_v54 }
 0xa6e   :  { %v1291_v16 = vsel %vm652_vm3, %v1289_v3, %v1283_v18 }
 0xa6f   :  { %v1295_v25 = vpop.permute.xlu1 %1294  ;;  %v1293_v4 = vmul.f32 %v1291_v16, %v1916_v53 }
 0xa70   :  { %v1300_v20 = vadd.f32 %v1295_v25, %v1292_v13 }
 0xa71   :  { %v1297_v6 = vpop.permute.xlu0 %1296 }
 0xa72   :  { %v1301_v7 = vadd.f32 %v1297_v6, %v1293_v4  ;;  %v1302_v8 = vmax.f32 %v1300_v20, 0.0 }
 0xa74   :  { %v1303_v11 = vmax.f32 %v1301_v7, 0.0 }
 0xa76   :  { %v1304_v12 = vpack.c.bf16 %v1303_v11, %v1302_v8 }
 0xa78   :  { %1577 = vmatmul.mubr.msk.bf16.vlgmr.msra.gmra.mrb[36].mxu0 %vm701_vm4, %v1304_v12 }
 0xb4b   :  { %v1365_v31 = vpop.f32.mrb[36].mxu0 }
 0xb4c   :  { %v1366_v54 = vadd.f32 %v1414_v14, %v1365_v31  ;;  %v1578_v15 = vpop.f32.mrb[37].mxu0 }
 0xb4d   :  { %v1368_v35 = vpop.f32.mrb[38].mxu0 }
 0xb4e   :  { %1372 = vst [vmem:[#allocation2] sm:$0xff] %v1366_v54  ;;  %v1369_v53 = vadd.f32 %v1414_v14, %v1368_v35  ;;  %v1579_v17 = vpop.f32.mrb[39].mxu0 }
 0xb50   :  { %1373 = vst [vmem:[#allocation2 + $0x8] sm:$0xff] %v1369_v53 }
 0xb51   :  { %1677 = shalt.err (!%p1674_p4)
}
 0xb52   :  { %s1678_s4 = scalar_lea.hbm %s2086_s9, 256 }
 0xb53   :  { %p1679_p5 = scmp.ne.s32.totalorder %s2086_s9, %s1678_s4  ;;  %p1682_p6 = scmp.lt.u32.totalorder %s1678_s4, %s2086_s9 }
 0xb55   :  { %p1684_p7 = pnand %p1682_p6, %p1679_p5 }
 0xb57   :  { %1687 = shalt.err (!%p1684_p7)
}
 0xb58   :  { %s1703_s18 = smov 128  }
 0xb59   :  { %1385 = dma.vmem_to_hbm [thread:$0]  %s1380_s3, 256, %s2086_s9, [#allocation3], %s1703_s18, %s1703_s18, %s1698_s23  }
 0xb5a   :  { %1688 = dma.done.wait [#allocation3], 256  }
 0xb5b   :  { %1689 = vsyncadd [#allocation3], 4294967040 }
 0xb5c   :  { %1389 = vsyncpa [#allocation3], 1 }

</bundles_post_ra>
